<compile_context>
chip_gen: v5e
topology: v5e:2x2
jax: 0.10.0
libtpu: 0.0.40
codegen_flags: <defaults>
</compile_context>

<pallas_src>
import functools

import jax
import jax.numpy as jnp
from jax.experimental import pallas as pl
from jax.experimental.pallas import tpu as pltpu

IGNORE_INDEX = -1


def _round_up(x, m):
    return ((x + m - 1) // m) * m


def _ce2d_kernel(x_ref, t_ref, loss_ref, cnt_ref, loss_acc, cnt_acc, *, hw, tile_p):
    """Per-tile cross-entropy partial sums.

    x_ref:    (1, C, TP) logits tile  (channels on sublanes, pixels on lanes)
    t_ref:    (1, 1, TP) int32 targets tile
    loss_ref, cnt_ref: (1, 1, 1) per-batch partial outputs (written once)
    loss_acc, cnt_acc: (1, TP) f32 per-lane running sums (VMEM scratch)
    """
    p = pl.program_id(1)

    @pl.when(p == 0)
    def _init():
        loss_acc[...] = jnp.zeros_like(loss_acc)
        cnt_acc[...] = jnp.zeros_like(cnt_acc)

    x = x_ref[0].astype(jnp.float32)          # (C, TP)
    t = t_ref[0]                              # (1, TP) int32

    # log-sum-exp over the channel (sublane) axis.
    m = jnp.max(x, axis=0, keepdims=True)                                # (1, TP)
    lse = m + jnp.log(jnp.sum(jnp.exp(x - m), axis=0, keepdims=True))    # (1, TP)

    # Gather x[target, pixel] via one-hot compare; never materialize the full
    # log-softmax tile:  -log_softmax[t] == lse - x[t].
    ch = jax.lax.broadcasted_iota(jnp.int32, x.shape, dimension=0)       # (C, TP)
    picked_x = jnp.sum(jnp.where(ch == t, x, 0.0), axis=0, keepdims=True)
    nll = lse - picked_x                                                  # (1, TP)

    # Mask ignore_index and the ragged/padded tail of the last pixel tile
    # (padded lanes may hold garbage logits/targets -> use where, not multiply,
    # so NaN/inf in the padded region cannot leak into the accumulator).
    lane = jax.lax.broadcasted_iota(jnp.int32, t.shape, dimension=1)      # (1, TP)
    in_range = (p * tile_p + lane) < hw
    # NOTE: targets are assumed to lie in [0, C) or equal ignore_index (-1),
    # matching the PyTorch precondition (out-of-range targets raise there).
    valid = jnp.logical_and(t != IGNORE_INDEX, in_range)

    loss_acc[...] += jnp.where(valid, nll, 0.0)
    cnt_acc[...] += jnp.where(valid, 1.0, 0.0)

    # Cross-lane reduce + scalar store only once, at the last pixel tile.
    @pl.when(p == pl.num_programs(1) - 1)
    def _finalize():
        loss_ref[...] = jnp.sum(loss_acc[...]).reshape(1, 1, 1)
        cnt_ref[...] = jnp.sum(cnt_acc[...]).reshape(1, 1, 1)


@functools.partial(jax.jit, static_argnames=("tile_p",))
def cross_entropy_2d(outputs, targets, tile_p=None):
    """outputs: (N, C, H, W) float (f32 or bf16); targets: (N, H, W) int.

    Returns scalar f32 mean cross-entropy over non-ignored pixels.
    """
    N, C, H, W = outputs.shape
    HW = H * W

    if tile_p is None:
        # Largest lane-aligned pixel tile up to 2048, capped at the padded
        # per-image pixel count; shrink if the double-buffered logits tile
        # would crowd scoped VMEM (only matters for very large C).
        tile_p = min(2048, _round_up(HW, 128))
        per_pixel_bytes = 2 * _round_up(C, 8) * 4        # 2 buffers, f32 layout
        while tile_p > 128 and tile_p * per_pixel_bytes > 8 * 1024 * 1024:
            tile_p = _round_up(tile_p // 2, 128)

    # NCHW consumed directly: free reshapes only (no transpose, no pad passes).
    x = outputs.reshape(N, C, HW)
    t = targets.reshape(N, 1, HW).astype(jnp.int32)      # lane-dense targets

    num_pt = -(-HW // tile_p)
    grid = (N, num_pt)

    kernel = functools.partial(_ce2d_kernel, hw=HW, tile_p=tile_p)

    loss_parts, cnt_parts = pl.pallas_call(
        kernel,
        out_shape=(
            jax.ShapeDtypeStruct((N, 1, 1), jnp.float32),
            jax.ShapeDtypeStruct((N, 1, 1), jnp.float32),
        ),
        grid_spec=pltpu.PrefetchScalarGridSpec(
            num_scalar_prefetch=0,
            grid=grid,
            in_specs=[
                pl.BlockSpec((1, C, tile_p), lambda n, p: (n, 0, p)),
                pl.BlockSpec((1, 1, tile_p), lambda n, p: (n, 0, p)),
            ],
            out_specs=[
                pl.BlockSpec((1, 1, 1), lambda n, p: (n, 0, 0)),
                pl.BlockSpec((1, 1, 1), lambda n, p: (n, 0, 0)),
            ],
            scratch_shapes=[
                pltpu.VMEM((1, tile_p), jnp.float32),
                pltpu.VMEM((1, tile_p), jnp.float32),
            ],
        ),
        compiler_params=pltpu.CompilerParams(
            dimension_semantics=("parallel", "arbitrary"),
            vmem_limit_bytes=32 * 1024 * 1024,
        ),
    )(x, t)

    # reduction='mean' with weight=None: divide by number of non-ignored pixels.
    return (jnp.sum(loss_parts) / jnp.sum(cnt_parts)).astype(jnp.float32)


def _reference(outputs, targets):
    """Pure-JAX reference for sanity checking."""
    N, C, H, W = outputs.shape
    lsm = jax.nn.log_softmax(outputs.astype(jnp.float32), axis=1)
    lsm = jnp.transpose(lsm, (0, 2, 3, 1)).reshape(-1, C)
    t = targets.reshape(-1)
    valid = t != IGNORE_INDEX
    safe_t = jnp.where(valid, t, 0)
    picked = jnp.take_along_axis(lsm, safe_t[:, None], axis=1)[:, 0]
    loss = -jnp.sum(jnp.where(valid, picked, 0.0))
    return loss / jnp.sum(valid.astype(jnp.float32))


if __name__ == "__main__":
    key = jax.random.PRNGKey(0)
    k1, k2 = jax.random.split(key)

    N, C, H, W = 2, 4, 16, 16
    outputs = jax.random.normal(k1, (N, C, H, W), dtype=jnp.float32)
    # Targets in [0, C); sprinkle some ignore_index (-1) pixels.
    targets = jax.random.randint(k2, (N, H, W), 0, C, dtype=jnp.int32)
    targets = targets.at[0, 0, :4].set(IGNORE_INDEX)

    loss = cross_entropy_2d(outputs, targets)
    loss = jax.block_until_ready(loss)

    ref = _reference(outputs, targets)
    assert jnp.allclose(loss, ref, rtol=1e-5, atol=1e-5), (loss, ref)

    print("KERNEL_OK")
</pallas_src>

<mosaic_0001>
module attributes {stable_mosaic.version = 11 : i64} {
  func.func @_ce2d_kernel(%arg0: i32, %arg1: i32, %arg2: memref<1x4x256xf32, #tpu.memory_space<vmem>>, %arg3: memref<1x1x256xi32, #tpu.memory_space<vmem>>, %arg4: memref<1x1x1xf32, #tpu.memory_space<vmem>>, %arg5: memref<1x1x1xf32, #tpu.memory_space<vmem>>, %arg6: memref<1x256xf32, #tpu.memory_space<vmem>>, %arg7: memref<1x256xf32, #tpu.memory_space<vmem>>) attributes {dimension_semantics = [#tpu.dimension_semantics<parallel>, #tpu.dimension_semantics<arbitrary>], iteration_bounds = array<i64: 2, 1>, scalar_prefetch = 0 : i64, scratch_operands = 2 : i64, tpu.core_type = #tpu.core_type<tc>, window_params = [{transform_indices = @transform_0, window_bounds = array<i64: 1, 4, 256>}, {transform_indices = @transform_1, window_bounds = array<i64: 1, 1, 256>}, {transform_indices = @transform_2, window_bounds = array<i64: 1, 1, 1>}, {transform_indices = @transform_3, window_bounds = array<i64: 1, 1, 1>}]} {
    %c0_i32 = arith.constant 0 : i32
    %0 = arith.cmpi eq, %arg1, %c0_i32 : i32
    %1 = arith.extui %0 : i1 to i32
    %c0_i32_0 = arith.constant 0 : i32
    %2 = arith.cmpi ne, %1, %c0_i32_0 : i32
    scf.if %2 {
      %cst_23 = arith.constant 0.000000e+00 : f32
      %47 = vector.broadcast %cst_23 : f32 to vector<1x256xf32>
      %c0_24 = arith.constant 0 : index
      %c0_25 = arith.constant 0 : index
      %48 = vector.load %arg6[%c0_24, %c0_25] : memref<1x256xf32, #tpu.memory_space<vmem>>, vector<1x256xf32>
      tpu.vector_store %arg6[%c0_24, %c0_25], %47 {strides = array<i32>} : memref<1x256xf32, #tpu.memory_space<vmem>>, vector<1x256xf32>,
      %cst_26 = arith.constant 0.000000e+00 : f32
      %49 = vector.broadcast %cst_26 : f32 to vector<1x256xf32>
      %c0_27 = arith.constant 0 : index
      %c0_28 = arith.constant 0 : index
      %50 = vector.load %arg7[%c0_27, %c0_28] : memref<1x256xf32, #tpu.memory_space<vmem>>, vector<1x256xf32>
      tpu.vector_store %arg7[%c0_27, %c0_28], %49 {strides = array<i32>} : memref<1x256xf32, #tpu.memory_space<vmem>>, vector<1x256xf32>,
    } else {
    }
    %c0 = arith.constant 0 : index
    %c0_1 = arith.constant 0 : index
    %c0_2 = arith.constant 0 : index
    %3 = vector.load %arg2[%c0, %c0_1, %c0_2] : memref<1x4x256xf32, #tpu.memory_space<vmem>>, vector<1x4x256xf32>
    %4 = vector.shape_cast %3 : vector<1x4x256xf32> to vector<4x256xf32>
    %c0_3 = arith.constant 0 : index
    %c0_4 = arith.constant 0 : index
    %c0_5 = arith.constant 0 : index
    %5 = vector.load %arg3[%c0_3, %c0_4, %c0_5] : memref<1x1x256xi32, #tpu.memory_space<vmem>>, vector<1x1x256xi32>
    %6 = vector.shape_cast %5 : vector<1x1x256xi32> to vector<1x256xi32>
    %cst = arith.constant dense<0xFF800000> : vector<256xf32>
    %7 = vector.multi_reduction <maximumf>, %4, %cst [0] : vector<4x256xf32> to vector<256xf32>
    %8 = vector.shape_cast %7 : vector<256xf32> to vector<1x256xf32>
    %9 = vector.broadcast %8 : vector<1x256xf32> to vector<4x256xf32>
    %10 = arith.subf %4, %9 : vector<4x256xf32>
    %11 = math.exp %10 : vector<4x256xf32>
    %cst_6 = arith.constant dense<0.000000e+00> : vector<256xf32>
    %12 = vector.multi_reduction <add>, %11, %cst_6 [0] : vector<4x256xf32> to vector<256xf32>
    %13 = vector.shape_cast %12 : vector<256xf32> to vector<1x256xf32>
    %14 = math.log %13 : vector<1x256xf32>
    %15 = arith.addf %8, %14 : vector<1x256xf32>
    %16 = tpu.iota {dimensions = array<i32: 0>} : vector<4x256xi32>
    %17 = vector.broadcast %6 : vector<1x256xi32> to vector<4x256xi32>
    %18 = arith.cmpi eq, %16, %17 : vector<4x256xi32>
    %cst_7 = arith.constant 0.000000e+00 : f32
    %19 = vector.broadcast %cst_7 : f32 to vector<4x256xf32>
    %20 = arith.select %18, %4, %19 : vector<4x256xi1>, vector<4x256xf32>
    %cst_8 = arith.constant dense<0.000000e+00> : vector<256xf32>
    %21 = vector.multi_reduction <add>, %20, %cst_8 [0] : vector<4x256xf32> to vector<256xf32>
    %22 = vector.shape_cast %21 : vector<256xf32> to vector<1x256xf32>
    %23 = arith.subf %15, %22 : vector<1x256xf32>
    %24 = tpu.iota {dimensions = array<i32: 1>} : vector<1x256xi32>
    %c256_i32 = arith.constant 256 : i32
    %25 = arith.muli %arg1, %c256_i32 : i32
    %26 = vector.broadcast %25 : i32 to vector<1x256xi32>
    %27 = arith.addi %26, %24 : vector<1x256xi32>
    %c256_i32_9 = arith.constant 256 : i32
    %28 = vector.broadcast %c256_i32_9 : i32 to vector<1x256xi32>
    %29 = arith.cmpi slt, %27, %28 : vector<1x256xi32>
    %c-1_i32 = arith.constant -1 : i32
    %30 = vector.broadcast %c-1_i32 : i32 to vector<1x256xi32>
    %31 = arith.cmpi ne, %6, %30 : vector<1x256xi32>
    %32 = arith.andi %31, %29 : vector<1x256xi1>
    %c0_10 = arith.constant 0 : index
    %c0_11 = arith.constant 0 : index
    %33 = vector.load %arg6[%c0_10, %c0_11] : memref<1x256xf32, #tpu.memory_space<vmem>>, vector<1x256xf32>
    %cst_12 = arith.constant 0.000000e+00 : f32
    %34 = vector.broadcast %cst_12 : f32 to vector<1x256xf32>
    %35 = arith.select %32, %23, %34 : vector<1x256xi1>, vector<1x256xf32>
    %36 = arith.addf %33, %35 : vector<1x256xf32>
    %c0_13 = arith.constant 0 : index
    %c0_14 = arith.constant 0 : index
    %37 = vector.load %arg6[%c0_13, %c0_14] : memref<1x256xf32, #tpu.memory_space<vmem>>, vector<1x256xf32>
    tpu.vector_store %arg6[%c0_13, %c0_14], %36 {strides = array<i32>} : memref<1x256xf32, #tpu.memory_space<vmem>>, vector<1x256xf32>,
    %c0_15 = arith.constant 0 : index
    %c0_16 = arith.constant 0 : index
    %38 = vector.load %arg7[%c0_15, %c0_16] : memref<1x256xf32, #tpu.memory_space<vmem>>, vector<1x256xf32>
    %cst_17 = arith.constant 1.000000e+00 : f32
    %cst_18 = arith.constant 0.000000e+00 : f32
    %39 = vector.broadcast %cst_17 : f32 to vector<1x256xf32>
    %40 = vector.broadcast %cst_18 : f32 to vector<1x256xf32>
    %41 = arith.select %32, %39, %40 : vector<1x256xi1>, vector<1x256xf32>
    %42 = arith.addf %38, %41 : vector<1x256xf32>
    %c0_19 = arith.constant 0 : index
    %c0_20 = arith.constant 0 : index
    %43 = vector.load %arg7[%c0_19, %c0_20] : memref<1x256xf32, #tpu.memory_space<vmem>>, vector<1x256xf32>
    tpu.vector_store %arg7[%c0_19, %c0_20], %42 {strides = array<i32>} : memref<1x256xf32, #tpu.memory_space<vmem>>, vector<1x256xf32>,
    %c0_i32_21 = arith.constant 0 : i32
    %44 = arith.cmpi eq, %arg1, %c0_i32_21 : i32
    %45 = arith.extui %44 : i1 to i32
    %c0_i32_22 = arith.constant 0 : i32
    %46 = arith.cmpi ne, %45, %c0_i32_22 : i32
    scf.if %46 {
      %c0_23 = arith.constant 0 : index
      %c0_24 = arith.constant 0 : index
      %47 = vector.load %arg6[%c0_23, %c0_24] : memref<1x256xf32, #tpu.memory_space<vmem>>, vector<1x256xf32>
      %48 = vector.shape_cast %47 : vector<1x256xf32> to vector<1x1x256xf32>
      %cst_25 = arith.constant dense<0.000000e+00> : vector<1xf32>
      %49 = vector.multi_reduction <add>, %48, %cst_25 [1, 2] : vector<1x1x256xf32> to vector<1xf32>
      %50 = vector.shape_cast %49 : vector<1xf32> to vector<1x1x1xf32>
      %51 = vector.extract %50[0, 0, 0] : f32 from vector<1x1x1xf32>
      %52 = vector.broadcast %51 : f32 to vector<1x1x1xf32>
      %c0_26 = arith.constant 0 : index
      %c0_27 = arith.constant 0 : index
      %c0_28 = arith.constant 0 : index
      %53 = vector.load %arg4[%c0_26, %c0_27, %c0_28] : memref<1x1x1xf32, #tpu.memory_space<vmem>>, vector<1x1x1xf32>
      tpu.vector_store %arg4[%c0_26, %c0_27, %c0_28], %52 {strides = array<i32>} : memref<1x1x1xf32, #tpu.memory_space<vmem>>, vector<1x1x1xf32>,
      %c0_29 = arith.constant 0 : index
      %c0_30 = arith.constant 0 : index
      %54 = vector.load %arg7[%c0_29, %c0_30] : memref<1x256xf32, #tpu.memory_space<vmem>>, vector<1x256xf32>
      %55 = vector.shape_cast %54 : vector<1x256xf32> to vector<1x1x256xf32>
      %cst_31 = arith.constant dense<0.000000e+00> : vector<1xf32>
      %56 = vector.multi_reduction <add>, %55, %cst_31 [1, 2] : vector<1x1x256xf32> to vector<1xf32>
      %57 = vector.shape_cast %56 : vector<1xf32> to vector<1x1x1xf32>
      %58 = vector.extract %57[0, 0, 0] : f32 from vector<1x1x1xf32>
      %59 = vector.broadcast %58 : f32 to vector<1x1x1xf32>
      %c0_32 = arith.constant 0 : index
      %c0_33 = arith.constant 0 : index
      %c0_34 = arith.constant 0 : index
      %60 = vector.load %arg5[%c0_32, %c0_33, %c0_34] : memref<1x1x1xf32, #tpu.memory_space<vmem>>, vector<1x1x1xf32>
      tpu.vector_store %arg5[%c0_32, %c0_33, %c0_34], %59 {strides = array<i32>} : memref<1x1x1xf32, #tpu.memory_space<vmem>>, vector<1x1x1xf32>,
    } else {
    }
    return
  }
  func.func @transform_0(%arg0: i32, %arg1: i32) -> (i32, i32, i32) {
    %c0_i32 = arith.constant 0 : i32
    %c0_i32_0 = arith.constant 0 : i32
    return %arg0, %c0_i32, %arg1 : i32, i32, i32
  }
  func.func @transform_1(%arg0: i32, %arg1: i32) -> (i32, i32, i32) {
    %c0_i32 = arith.constant 0 : i32
    %c0_i32_0 = arith.constant 0 : i32
    return %arg0, %c0_i32, %arg1 : i32, i32, i32
  }
  func.func @transform_2(%arg0: i32, %arg1: i32) -> (i32, i32, i32) {
    %c0_i32 = arith.constant 0 : i32
    %c0_i32_0 = arith.constant 0 : i32
    %c0_i32_1 = arith.constant 0 : i32
    return %arg0, %c0_i32, %c0_i32_0 : i32, i32, i32
  }
  func.func @transform_3(%arg0: i32, %arg1: i32) -> (i32, i32, i32) {
    %c0_i32 = arith.constant 0 : i32
    %c0_i32_0 = arith.constant 0 : i32
    %c0_i32_1 = arith.constant 0 : i32
    return %arg0, %c0_i32, %c0_i32_0 : i32, i32, i32
  }
}

</mosaic_0001>

<bundles_post_ra>
// kernel: cross_entropy_2d.1
= control target key start
LH: loop header
LB: loop body
LE: loop exit
PB: predicated region body
PF: predicated region fallthrough
CT: control target
= control target key end

     0   :  { %s605_s12 = smov 0   ;;  %s607_s13 = smov 0   ;;  %s691_s0 = inlined_call_operand.vmem [shape: f32[2,4,256], index: 0, kind: input, shape index: {}]   ;;  %s692_s1 = inlined_call_operand.vmem [shape: s32[2,1,256], index: 1, kind: input, shape index: {}]   ;;  %s693_s2 = inlined_call_operand.vmem [shape: f32[2,1,1], index: 2, kind: output, shape index: {0}]   ;;  %s694_s3 = inlined_call_operand.vmem [shape: f32[2,1,1], index: 3, kind: output, shape index: {1}]  }
   0x1   :  { %s609_s14 = smov 0  }
   0x2 LB: > { %s26_s15 = sadd.s32 1, %s577_s13  ;;  %p516_p0 = scmp.ge.s32.totalorder %s581_s14, 1  ;;  %s581_s14 = sphi %s609_s14, %s14_s14   ;;  %s577_s13 = sphi %s607_s13, %s700_s13   ;;  %s573_s12 = sphi %s605_s12, %s699_s12  }
   0x3   : > { %p28_p1 = scmp.ge.s32.totalorder %s26_s15, 2  ;;  %p175_p2 = scmp.lt.s32.totalorder %s581_s14, 3 }
   0x5   : > { %s702_s15 = smov (%p28_p1, %s26_s15), 0  ;;  %p176_p3 = pnand %p516_p0, %p175_p2 }
   0x6   : > { %p213_p4 = scmp.lt.s32.totalorder (!%p176_p3), %s573_s12, 1 }
   0x7   : > { %179 = sbr.rel (%p176_p3) target bundleno = 294 (0x126), region = 28 }
   0xc   : > { %v241_v0 = vlaneseq  ;;  %s704_s12 = smov (!%p213_p4, %s573_s12), 1  ;;  %v583_v2 = vmov 0.0   ;;  %vm255_vm1 = vcmask 1043456   ;;  %v584_v25 = vmov 1  }
   0xd   : > { %s522_s16 = sshll.u32 %s704_s12, 3  ;;  %s519_s20 = sshll.u32 %s704_s12, 1  ;;  %v345_v26 = vrot.slane %v584_v25, 7  ;;  %vm346_vm2 = vcmask 1040384   ;;  %vm389_vm8 = vcmask 0  }
   0xe   : > { %vm625_vm0 = vcmp.lt.s32.totalorder %v241_v0, 256  ;;  %s220_s19 = scalar_lea.vmem %s691_s0, %s522_s16  ;;  %s229_s23 = scalar_lea.vmem %s692_s1, %s519_s20  ;;  %v305_v33 = vshrl.u32 %v241_v0, 7 }
   0xf   : > { %245 = vst.msk [vmem:[#allocation2] sm:$0x3] %vm625_vm0, %v583_v2  ;;  %v247_v3 = vld [vmem:[%s220_s19] sm:$0xff]  ;;  %v347_v27 = vsel %vm346_vm2, 1, %v345_v26  ;;  %s233_s26 = scalar_lea.vmem %s693_s2, %s704_s12  ;;  %s236_s30 = scalar_lea.vmem %s694_s3, %s704_s12 }
  0x10   : > { %246 = vst.msk [vmem:[#allocation3] sm:$0x3] %vm625_vm0, %v583_v2  ;;  %v248_v28 = vld [vmem:[%s229_s23] sm:$0x3]  ;;  %vm348_vm4 = vcmp.ne.s32.totalorder %v347_v27, 0 }
  0x11   : > { %250 = vst [vmem:[#allocation1] ss:$2 sm:$0xff] %v247_v3  ;;  %vm342_vm3 = vcmp.ne.s32.totalorder %v248_v28, 4294967295  ;;  %v307_v34 = vperm.slane %v248_v28, 1  ;;  %v306_v38 = vperm.slane %v248_v28, 0 }
  0x12   : > { %vm653_vm5 = vmand %vm342_vm3, %vm348_vm4 }
  0x13   : > { %v364_v40 = vsel %vm653_vm5, 1.0, %v583_v2  ;;  %vm308_vm6 = vcmp.eq.s32.totalorder %v305_v33, %v306_v38  ;;  %vm309_vm7 = vcmp.eq.s32.totalorder %v305_v33, %v307_v34 }
  0x17   : > { %v363_v39 = vld [vmem:[#allocation3] sm:$0x3] }
  0x18   : > { %v251_v4 = vld.sshfl [vmem:[#allocation1] sm:$0xff pattern:$0x75316420]  ;;  %v252_v5 = vld.sshfl [vmem:[#allocation1 + $0x8] sm:$0xff pattern:$0x75316420]  ;;  %v365_v41 = vadd.f32 %v364_v40, %v363_v39 }
  0x19   : > { %v256_v6 = vsel %vm255_vm1, %v251_v4, -inf  ;;  %v263_v7 = vsel %vm255_vm1, %v252_v5, -inf }
  0x1a   : > { %v257_v8 = vrot.slane %v256_v6, 4  ;;  %v264_v9 = vrot.slane %v263_v7, 4  ;;  %366 = vst.msk [vmem:[#allocation3] sm:$0x3] %vm625_vm0, %v365_v41 }
  0x1c   : > { %v258_v10 = vmax.f32 %v256_v6, %v257_v8  ;;  %v265_v11 = vmax.f32 %v263_v7, %v264_v9 }
  0x1e   : > { %v259_v12 = vrot.slane %v258_v10, 2  ;;  %v266_v13 = vrot.slane %v265_v11, 2 }
  0x20   : > { %v260_v14 = vmax.f32 %v258_v10, %v259_v12  ;;  %v267_v15 = vmax.f32 %v265_v11, %v266_v13 }
  0x22   : > { %v261_v16 = vrot.slane %v260_v14, 1  ;;  %v268_v17 = vrot.slane %v267_v15, 1 }
  0x24   : > { %v639_v18 = vmax.f32 %v260_v14, %v261_v16  ;;  %v641_v19 = vmax.f32 %v267_v15, %v268_v17  ;;  %v350_v16 = vld [vmem:[#allocation2] sm:$0x3] }
  0x26   : > { %v272_v20 = vrot.slane %v641_v19, 4 }
  0x28   : > { %v273_v21 = vsel %vm255_vm1, %v639_v18, %v272_v20 }
  0x29   : > { %v275_v22 = vsub.f32 %v247_v3, %v273_v21 }
  0x2b   : > { %v276_v23 = vmul.f32 1.442695, %v275_v22 }
  0x2d   : > { %553 = vpow2.f32 %v276_v23  ;;  %v391_v23 = vld [vmem:[#allocation3] sm:$0x3] }
  0x2e   : > { %v393_v26 = vperm.slane %v391_v23, 0  ;;  %v394_v27 = vperm.slane %v391_v23, 1 }
  0x33   : > { %v554_v24 = vpop.eup %553 }
  0x34   : > { %279 = vst [vmem:[#allocation1] ss:$2 sm:$0xff] %v554_v24 }
  0x3b   : > { %v280_v29 = vld.sshfl [vmem:[#allocation1] sm:$0xff pattern:$0x75316420]  ;;  %v281_v30 = vld.sshfl [vmem:[#allocation1 + $0x8] sm:$0xff pattern:$0x75316420] }
  0x3c   : > { %v284_v31 = vsel %vm255_vm1, %v280_v29, 0.0  ;;  %v291_v32 = vsel %vm255_vm1, %v281_v30, 0.0  ;;  %310 = vst [vmem:[#allocation1] ss:$2 sm:$0xff] %v247_v3  ;;  %v397_v29 = vsel %vm346_vm2, %v393_v26, 0.0  ;;  %v398_v30 = vsel %vm346_vm2, %v394_v27, 0.0 }
  0x3d   : > { %v285_v36 = vrot.slane %v284_v31, 4  ;;  %v292_v37 = vrot.slane %v291_v32, 4 }
  0x3f   : > { %v286_v42 = vadd.f32 %v285_v36, %v284_v31  ;;  %v293_v43 = vadd.f32 %v292_v37, %v291_v32  ;;  %v399_v31 = vadd.f32 %v398_v30, %v397_v29 }
  0x41   : > { %v287_v44 = vrot.slane %v286_v42, 2  ;;  %v294_v45 = vrot.slane %v293_v43, 2 }
  0x43   : > { %v288_v46 = vadd.f32 %v287_v44, %v286_v42  ;;  %v295_v47 = vadd.f32 %v294_v45, %v293_v43  ;;  %v311_v48 = vld.sshfl [vmem:[#allocation1] sm:$0xff pattern:$0x75316420]  ;;  %v312_v49 = vld.sshfl [vmem:[#allocation1 + $0x8] sm:$0xff pattern:$0x75316420] }
  0x44   : > { %v315_v50 = vsel %vm308_vm6, %v311_v48, 0.0  ;;  %v316_v51 = vsel %vm309_vm7, %v312_v49, 0.0 }
  0x45   : > { %v289_v52 = vrot.slane %v288_v46, 1  ;;  %v296_v53 = vrot.slane %v295_v47, 1  ;;  %v317_v54 = vsel %vm255_vm1, %v315_v50, 0.0  ;;  %v324_v55 = vsel %vm255_vm1, %v316_v51, 0.0 }
  0x46   : > { %v318_v56 = vrot.slane %v317_v54, 4  ;;  %v325_v57 = vrot.slane %v324_v55, 4 }
  0x47   : > { %v290_v58 = vadd.f32 %v289_v52, %v288_v46  ;;  %v297_v59 = vadd.f32 %v296_v53, %v295_v47 }
  0x48   : > { %v319_v60 = vadd.f32 %v318_v56, %v317_v54  ;;  %v326_v61 = vadd.f32 %v325_v57, %v324_v55 }
  0x49   : > { %555 = vlog2.f32 %v290_v58 }
  0x4a   : > { %557 = vlog2.f32 %v297_v59  ;;  %v320_v62 = vrot.slane %v319_v60, 2  ;;  %v327_v63 = vrot.slane %v326_v61, 2 }
  0x4c   : > { %v321_v0 = vadd.f32 %v320_v62, %v319_v60  ;;  %v328_v2 = vadd.f32 %v327_v63, %v326_v61 }
  0x4e   : > { %v322_v3 = vrot.slane %v321_v0, 1  ;;  %v329_v4 = vrot.slane %v328_v2, 1 }
  0x4f   : > { %v556_v5 = vpop.eup %555 }
  0x50   : > { %v558_v6 = vpop.eup %557  ;;  %v299_v7 = vmul.f32 0.6931472, %v556_v5  ;;  %v323_v9 = vadd.f32 %v322_v3, %v321_v0  ;;  %v330_v10 = vadd.f32 %v329_v4, %v328_v2 }
  0x51   : > { %v301_v8 = vmul.f32 0.6931472, %v558_v6 }
  0x52   : > { %v302_v11 = vadd.f32 %v299_v7, %v639_v18 }
  0x53   : > { %v303_v12 = vadd.f32 %v301_v8, %v641_v19 }
  0x54   : > { %v331_v13 = vsub.f32 %v302_v11, %v323_v9 }
  0x55   : > { %v332_v14 = vsub.f32 %v303_v12, %v330_v10 }
  0x57   : > { %v353_v15 = vrot.slane %v332_v14, 7 }
  0x59   : > { %v354_v17 = vsel %vm346_vm2, %v331_v13, %v353_v15 }
  0x5a   : > { %v356_v20 = vsel %vm653_vm5, %v354_v17, 0.0 }
  0x5b   : > { %v357_v21 = vadd.f32 %v356_v20, %v350_v16 }
  0x5d   : > { %362 = vst.msk [vmem:[#allocation2] sm:$0x3] %vm625_vm0, %v357_v21 }
  0x64   : > { %v370_v22 = vld [vmem:[#allocation2] sm:$0x3] }
  0x65   : > { %v372_v24 = vperm.slane %v370_v22, 0  ;;  %v373_v25 = vperm.slane %v370_v22, 1 }
  0x67   : > { %v376_v18 = vsel %vm346_vm2, %v372_v24, 0.0  ;;  %v377_v19 = vsel %vm346_vm2, %v373_v25, 0.0 }
  0x68   : > { %v378_v28 = vadd.f32 %v377_v19, %v376_v18 }
  0x6a   : > { %379 = vadd.xlane.f32.xlu0 %v378_v28 }
  0x72   : > { %400 = vadd.xlane.f32.xlu0 %v399_v31 }
  0xdd   : > { %v380_v1 = vpop.xlane.xlu0 %379 }
  0xde   : > { %v381_v32 = vrot.slane %v380_v1, 4 }
  0xe0   : > { %v382_v33 = vadd.f32 %v381_v32, %v380_v1 }
  0xe2   : > { %v383_v34 = vrot.slane %v382_v33, 2 }
  0xe4   : > { %v384_v35 = vadd.f32 %v383_v34, %v382_v33 }
  0xe5   : > { %v401_v36 = vpop.xlane.xlu0 %400 }
  0xe6   : > { %v402_v37 = vrot.slane %v401_v36, 4  ;;  %v385_v38 = vrot.slane %v384_v35, 1 }
  0xe8   : > { %v403_v39 = vadd.f32 %v402_v37, %v401_v36  ;;  %v386_v40 = vadd.f32 %v385_v38, %v384_v35 }
  0xea   : > { %v404_v41 = vrot.slane %v403_v39, 2  ;;  %523 = vpush %v386_v40 }
  0xec   : > { %v405_v42 = vadd.f32 %v404_v41, %v403_v39 }
  0xee   : > { %v406_v43 = vrot.slane %v405_v42, 1 }
  0xf0   : > { %v407_v44 = vadd.f32 %v406_v43, %v405_v42 }
  0xf2   : > { %525 = vpush %v407_v44 }
 0x11b   : > { %s524_s27 = spop %523 }
 0x11c   : > { %v388_v45 = vstv %s524_s27 }
 0x11d   : > { %390 = vst.msk [vmem:[%s233_s26] sm:$0x1] %vm389_vm8, %v388_v45 }
 0x123   : > { %s526_s4 = spop %525 }
 0x124   : > { %v409_v46 = vstv %s526_s4 }
 0x125   : > { %410 = vst.msk [vmem:[%s236_s30] sm:$0x1] %vm389_vm8, %v409_v46 }
 0x126 PF: > { %s14_s14 = sadd.s32 1, %s581_s14   ;;  %s699_s12 = smov %s577_s13 }
 0x127   : > { %p11_p5 = scmp.ge.s32.totalorder %s14_s14, 4   ;;  %s700_s13 = smov %s702_s15 }
 0x129   :  { %13 = sbr.rel (!%p11_p5) target bundleno = 2 (0x2), region = 81 }

</bundles_post_ra>
